<compile_context>
chip_gen: v6e
topology: v6e:2x2x1
jax: 0.10.0
libtpu: 0.0.40
codegen_flags: <defaults>
</compile_context>

<pallas_src>
import jax
import jax.numpy as jnp
from jax.experimental import pallas as pl
from jax.experimental.pallas import tpu as pltpu


def _round_up(x, m):
    return ((x + m - 1) // m) * m


def _choose_tk(d_in, cap):
    """Pick the K tile: full d_in if it fits the budget, otherwise the largest
    multiple of 128 that divides d_in (so no masking of the reduction axis is
    needed)."""
    if d_in <= cap:
        return d_in
    t = (cap // 128) * 128
    while t >= 128:
        if d_in % t == 0:
            return t
        t -= 128
    # TODO(synk): if d_in is huge and has no multiple-of-128 divisor, zero-pad
    # the K axis of x/W1 at data-prep time instead of this full-d_in fallback.
    return d_in


def embedding_kernel(a1_ref, x_ref, w1_ref, b1_ref, w2_ref, b2_ref, out_ref, acc_ref):
    """One (batch-tile, K-tile) step of the embedding net.

    Grid = (M tiles, K tiles); the K (d_in reduction) axis is innermost.
      x_ref  : (TM, TK)   streamed input tile          (input_dtype)
      w1_ref : (TK, Hp)   layer-1 weight K-slice       (input_dtype)
      b1_ref : (1, Hp)    layer-1 bias                 (f32, VMEM-resident)
      a1_ref : (1,)       PReLU alpha                  (f32, SMEM scalar)
      w2_ref : (Hp, Ep)   layer-2 weights              (input_dtype, VMEM-resident)
      b2_ref : (1, Ep)    layer-2 bias                 (f32, VMEM-resident)
      out_ref: (TM, Ep)   embedding tile               (out_dtype)
      acc_ref: (TM, Hp)   f32 accumulator scratch for the first matmul
    """
    k = pl.program_id(1)

    @pl.when(k == 0)
    def _():
        acc_ref[...] = jnp.zeros_like(acc_ref)

    # Linear(d_in -> hidden) partial product, f32 accumulation on the MXU.
    acc_ref[...] += jnp.dot(x_ref[...], w1_ref[...],
                            preferred_element_type=jnp.float32)

    @pl.when(k == pl.num_programs(1) - 1)
    def _():
        h = acc_ref[...] + b1_ref[...]
        a1 = a1_ref[0]                              # PReLU alpha: scalar SMEM read
        h = jnp.where(h >= 0, h, a1 * h)
        emb = jnp.dot(h.astype(w2_ref.dtype), w2_ref[...],
                      preferred_element_type=jnp.float32) + b2_ref[...]
        out_ref[...] = emb.astype(out_ref.dtype)


def _pad_params(params, input_dtype):
    """Zero-pad hidden/embedding dims to the 128-lane width (exact: PReLU(0)=0
    and zero W2 rows contribute nothing) and cast weights to the streaming dtype."""
    w1, b1, a1, w2, b2 = params
    _, hidden = w1.shape
    emb_dim = w2.shape[1]
    hp = _round_up(hidden, 128)
    ep = _round_up(emb_dim, 128)
    w1p = jnp.zeros((w1.shape[0], hp), input_dtype).at[:, :hidden].set(w1.astype(input_dtype))
    b1p = jnp.zeros((1, hp), jnp.float32).at[:, :hidden].set(b1)
    w2p = jnp.zeros((hp, ep), input_dtype).at[:hidden, :emb_dim].set(w2.astype(input_dtype))
    b2p = jnp.zeros((1, ep), jnp.float32).at[:, :emb_dim].set(b2)
    return (w1p, b1p, a1.astype(jnp.float32), w2p, b2p), emb_dim


def _embed_flat(x_flat, padded_params, emb_dim, *, tm, input_dtype, out_dtype, tk=None):
    """embedding_net on a flattened batch x_flat: (B, d_in) -> (B, emb_dim)."""
    w1p, b1p, a1, w2p, b2p = padded_params
    b, d_in = x_flat.shape
    hp = w1p.shape[1]
    ep = w2p.shape[1]
    isize = jnp.dtype(input_dtype).itemsize
    osize = jnp.dtype(out_dtype).itemsize

    # Batch tile: multiple of 8 sublanes; clamp so the parallel axis has >= 2
    # blocks whenever there is enough work (megacore occupancy on v7x).
    tm = max(8, min(tm, _round_up(b, 8)))
    if b > 8:
        tm = min(tm, _round_up(-(-b // 2), 8))

    # K (d_in) tile: keep the double-buffered x tile around <=16 MiB.
    if tk is None:
        x_budget = 16 * 1024 * 1024
        tk_cap = max(128, (x_budget // (2 * tm * isize)) // 128 * 128)
        tk = _choose_tk(d_in, tk_cap)

    grid = (pl.cdiv(b, tm), pl.cdiv(d_in, tk))

    # VMEM working set (double-buffered where pipelined) + headroom; never
    # request all of v7x's 64 MiB physical VMEM.
    ws = (2 * tm * tk * isize            # x (streamed)
          + 2 * tk * hp * isize          # W1 K-slice
          + 2 * hp * ep * isize          # W2
          + 2 * (hp + ep) * 4            # biases
          + 2 * tm * ep * osize          # output tile
          + tm * hp * 4)                 # f32 accumulator scratch
    vmem_limit = int(min(max(ws + (8 << 20), 16 << 20), 48 << 20))

    smem_spec = pl.BlockSpec(memory_space=pltpu.MemorySpace.SMEM)

    # For best bandwidth feed x already in input_dtype; this astype is a no-op
    # when dtypes match.
    xp = x_flat.astype(input_dtype)

    out = pl.pallas_call(
        embedding_kernel,
        out_shape=jax.ShapeDtypeStruct((b, ep), out_dtype),
        grid=grid,
        in_specs=[
            smem_spec,                                      # PReLU alpha (SMEM)
            pl.BlockSpec((tm, tk), lambda i, k: (i, k)),    # x: streamed tiles
            pl.BlockSpec((tk, hp), lambda i, k: (k, 0)),    # W1 K-slice
            pl.BlockSpec((1, hp), lambda i, k: (0, 0)),     # b1: resident
            pl.BlockSpec((hp, ep), lambda i, k: (0, 0)),    # W2: resident
            pl.BlockSpec((1, ep), lambda i, k: (0, 0)),     # b2: resident
        ],
        out_specs=pl.BlockSpec((tm, ep), lambda i, k: (i, 0)),
        scratch_shapes=[pltpu.VMEM((tm, hp), jnp.float32)],
        compiler_params=pltpu.CompilerParams(
            dimension_semantics=("parallel", "arbitrary"),
            vmem_limit_bytes=vmem_limit,
        ),
    )(a1, xp, w1p, b1p, w2p, b2p)

    return out[:, :emb_dim]


def triplet_net(x1, x2, x3, params, *, tm=2048, input_dtype=jnp.bfloat16, out_dtype=None):
    """TripletNet.forward: the shared embedding_net applied to x1, x2, x3.

    No jnp.concatenate: each input streams straight from its own HBM buffer;
    the padded weights (<1 MiB) are built once and reused across the three
    pallas_calls, so re-DMAing them is negligible next to the x traffic saved.
    """
    if out_dtype is None:
        out_dtype = input_dtype
    padded, emb_dim = _pad_params(params, input_dtype)
    return tuple(
        _embed_flat(x.reshape(x.shape[0], -1), padded, emb_dim,
                    tm=tm, input_dtype=input_dtype, out_dtype=out_dtype)
        for x in (x1, x2, x3))


def get_embedding(x, params, *, tm=2048, input_dtype=jnp.bfloat16, out_dtype=None, tk=None):
    """TripletNet.get_embedding(x)."""
    if out_dtype is None:
        out_dtype = input_dtype
    padded, emb_dim = _pad_params(params, input_dtype)
    return _embed_flat(x.reshape(x.shape[0], -1), padded, emb_dim,
                       tm=tm, input_dtype=input_dtype, out_dtype=out_dtype, tk=tk)


def init_params(key, d_in, hidden, emb_dim=2):
    """Deterministic synthetic parameters (PyTorch-style uniform fan-in init)."""
    ks = jax.random.split(key, 4)

    def lin(kw, kb, fan_in, fan_out):
        bound = 1.0 / jnp.sqrt(fan_in)
        w = jax.random.uniform(kw, (fan_in, fan_out), jnp.float32, -bound, bound)
        b = jax.random.uniform(kb, (1, fan_out), jnp.float32, -bound, bound)
        return w, b

    w1, b1 = lin(ks[0], ks[1], d_in, hidden)     # embedding_net layer 1
    w2, b2 = lin(ks[2], ks[3], hidden, emb_dim)  # embedding_net layer 2 -> 2-D embedding
    a1 = jnp.full((1,), 0.25, jnp.float32)       # PReLU alpha (PyTorch default init)
    return (w1, b1, a1, w2, b2)


def reference_embedding(x, params, input_dtype, out_dtype):
    """Pure-JAX reference for one embedding_net application (same dtype casts)."""
    w1, b1, a1, w2, b2 = params
    xf = x.reshape(x.shape[0], -1).astype(input_dtype)
    h = jnp.dot(xf, w1.astype(input_dtype), preferred_element_type=jnp.float32) + b1
    h = jnp.where(h >= 0, h, a1[0] * h)
    emb = jnp.dot(h.astype(input_dtype), w2.astype(input_dtype),
                  preferred_element_type=jnp.float32) + b2
    return emb.astype(out_dtype)


if __name__ == "__main__":
    key = jax.random.PRNGKey(0)
    k1, k2, k3, k4, kp = jax.random.split(key, 5)

    N, C, H, W = 2, 4, 16, 16
    hidden, emb_dim = 32, 2
    d_in = C * H * W

    x1 = jax.random.normal(k1, (N, C, H, W), jnp.float32)
    x2 = jax.random.normal(k2, (N, C, H, W), jnp.float32)
    x3 = jax.random.normal(k3, (N, C, H, W), jnp.float32)
    params = init_params(kp, d_in, hidden, emb_dim)

    # --- default fast path: bf16 streaming (x / W1 / W2, bf16 output),
    #     f32 MXU accumulation -> roughly halved HBM traffic.
    o1, o2, o3 = jax.block_until_ready(triplet_net(x1, x2, x3, params))
    assert o1.shape == (N, emb_dim) and o2.shape == (N, emb_dim) and o3.shape == (N, emb_dim)
    for o, x in ((o1, x1), (o2, x2), (o3, x3)):
        r = reference_embedding(x, params, jnp.bfloat16, jnp.bfloat16)
        assert jnp.allclose(o.astype(jnp.float32), r.astype(jnp.float32),
                            atol=3e-2, rtol=3e-2), "bf16 path mismatch vs reference"

    # --- f32 reference-precision path (faithful to the PyTorch module).
    f1, f2, f3 = jax.block_until_ready(
        triplet_net(x1, x2, x3, params, input_dtype=jnp.float32, out_dtype=jnp.float32))
    for o, x in ((f1, x1), (f2, x2), (f3, x3)):
        r = reference_embedding(x, params, jnp.float32, jnp.float32)
        assert jnp.allclose(o, r, atol=5e-3, rtol=5e-3), "f32 path mismatch vs reference"

    # --- exercise the K-tiled accumulator path (tk=512 -> 2 K steps) and a
    #     batch that is not a multiple of the tile (masked partial edge tile,
    #     plus the >=2-tile megacore clamp on the batch axis).
    xb = jax.random.normal(k4, (10, C, H, W), jnp.float32)
    e = jax.block_until_ready(
        get_embedding(xb, params, input_dtype=jnp.float32, out_dtype=jnp.float32, tk=512))
    r = reference_embedding(xb, params, jnp.float32, jnp.float32)
    assert e.shape == (10, emb_dim)
    assert jnp.allclose(e, r, atol=5e-3, rtol=5e-3), "K-tiled path mismatch vs reference"

    print("KERNEL_OK")
</pallas_src>

<mosaic_0001>
module attributes {stable_mosaic.version = 11 : i64} {
  func.func @embedding_kernel(%arg0: i32, %arg1: i32, %arg2: memref<1xf32, #tpu.memory_space<smem>>, %arg3: memref<8x1024xbf16, #tpu.memory_space<vmem>>, %arg4: memref<1024x128xbf16, #tpu.memory_space<vmem>>, %arg5: memref<1x128xf32, #tpu.memory_space<vmem>>, %arg6: memref<128x128xbf16, #tpu.memory_space<vmem>>, %arg7: memref<1x128xf32, #tpu.memory_space<vmem>>, %arg8: memref<8x128xbf16, #tpu.memory_space<vmem>>, %arg9: memref<8x128xf32, #tpu.memory_space<vmem>>) attributes {dimension_semantics = [#tpu.dimension_semantics<parallel>, #tpu.dimension_semantics<arbitrary>], iteration_bounds = array<i64: 1, 1>, scalar_prefetch = 0 : i64, scratch_operands = 1 : i64, tpu.core_type = #tpu.core_type<tc>, window_params = [{transform_indices = @transform_0, window_bounds = array<i64: 1>}, {transform_indices = @transform_1, window_bounds = array<i64: 8, 1024>}, {transform_indices = @transform_2, window_bounds = array<i64: 1024, 128>}, {pipeline_mode = #tpu.pipeline_mode<synchronous>, transform_indices = @transform_3, window_bounds = array<i64: 1, 128>}, {pipeline_mode = #tpu.pipeline_mode<synchronous>, transform_indices = @transform_4, window_bounds = array<i64: 128, 128>}, {pipeline_mode = #tpu.pipeline_mode<synchronous>, transform_indices = @transform_5, window_bounds = array<i64: 1, 128>}, {transform_indices = @transform_6, window_bounds = array<i64: 8, 128>}]} {
    %c0_i32 = arith.constant 0 : i32
    %0 = arith.cmpi eq, %arg1, %c0_i32 : i32
    %1 = arith.extui %0 : i1 to i32
    %c0_i32_0 = arith.constant 0 : i32
    %2 = arith.cmpi ne, %1, %c0_i32_0 : i32
    scf.if %2 {
      %cst_10 = arith.constant 0.000000e+00 : f32
      %12 = vector.broadcast %cst_10 : f32 to vector<8x128xf32>
      %c0_11 = arith.constant 0 : index
      %c0_12 = arith.constant 0 : index
      %13 = vector.load %arg9[%c0_11, %c0_12] : memref<8x128xf32, #tpu.memory_space<vmem>>, vector<8x128xf32>
      tpu.vector_store %arg9[%c0_11, %c0_12], %12 {strides = array<i32>} : memref<8x128xf32, #tpu.memory_space<vmem>>, vector<8x128xf32>,
    } else {
    }
    %c0 = arith.constant 0 : index
    %c0_1 = arith.constant 0 : index
    %3 = vector.load %arg9[%c0, %c0_1] : memref<8x128xf32, #tpu.memory_space<vmem>>, vector<8x128xf32>
    %c0_2 = arith.constant 0 : index
    %c0_3 = arith.constant 0 : index
    %4 = vector.load %arg3[%c0_2, %c0_3] : memref<8x1024xbf16, #tpu.memory_space<vmem>>, vector<8x1024xbf16>
    %c0_4 = arith.constant 0 : index
    %c0_5 = arith.constant 0 : index
    %5 = vector.load %arg4[%c0_4, %c0_5] : memref<1024x128xbf16, #tpu.memory_space<vmem>>, vector<1024x128xbf16>
    %cst = arith.constant dense<0.000000e+00> : vector<8x128xf32>
    %6 = tpu.matmul %4, %5, %cst {dimension_numbers = #tpu.dot_dimension_numbers<[1], [0], [0], [1], [0, 0, 1, 1], [], []>} : vector<8x1024xbf16>, vector<1024x128xbf16>, vector<8x128xf32> -> vector<8x128xf32>
    %7 = arith.addf %3, %6 : vector<8x128xf32>
    %c0_6 = arith.constant 0 : index
    %c0_7 = arith.constant 0 : index
    %8 = vector.load %arg9[%c0_6, %c0_7] : memref<8x128xf32, #tpu.memory_space<vmem>>, vector<8x128xf32>
    tpu.vector_store %arg9[%c0_6, %c0_7], %7 {strides = array<i32>} : memref<8x128xf32, #tpu.memory_space<vmem>>, vector<8x128xf32>,
    %c0_i32_8 = arith.constant 0 : i32
    %9 = arith.cmpi eq, %arg1, %c0_i32_8 : i32
    %10 = arith.extui %9 : i1 to i32
    %c0_i32_9 = arith.constant 0 : i32
    %11 = arith.cmpi ne, %10, %c0_i32_9 : i32
    scf.if %11 {
      %c0_10 = arith.constant 0 : index
      %c0_11 = arith.constant 0 : index
      %12 = vector.load %arg9[%c0_10, %c0_11] : memref<8x128xf32, #tpu.memory_space<vmem>>, vector<8x128xf32>
      %c0_12 = arith.constant 0 : index
      %c0_13 = arith.constant 0 : index
      %13 = vector.load %arg5[%c0_12, %c0_13] : memref<1x128xf32, #tpu.memory_space<vmem>>, vector<1x128xf32>
      %14 = vector.broadcast %13 : vector<1x128xf32> to vector<8x128xf32>
      %15 = arith.addf %12, %14 : vector<8x128xf32>
      %c0_14 = arith.constant 0 : index
      %16 = memref.load %arg2[%c0_14] : memref<1xf32, #tpu.memory_space<smem>>
      %cst_15 = arith.constant 0.000000e+00 : f32
      %17 = vector.broadcast %cst_15 : f32 to vector<8x128xf32>
      %18 = arith.cmpf oge, %15, %17 : vector<8x128xf32>
      %19 = vector.broadcast %16 : f32 to vector<8x128xf32>
      %20 = arith.mulf %19, %15 : vector<8x128xf32>
      %21 = arith.select %18, %15, %20 : vector<8x128xi1>, vector<8x128xf32>
      %22 = arith.truncf %21 : vector<8x128xf32> to vector<8x128xbf16>
      %c0_16 = arith.constant 0 : index
      %c0_17 = arith.constant 0 : index
      %23 = vector.load %arg6[%c0_16, %c0_17] : memref<128x128xbf16, #tpu.memory_space<vmem>>, vector<128x128xbf16>
      %cst_18 = arith.constant dense<0.000000e+00> : vector<8x128xf32>
      %24 = tpu.matmul %22, %23, %cst_18 {dimension_numbers = #tpu.dot_dimension_numbers<[1], [0], [0], [1], [0, 0, 1, 1], [], []>} : vector<8x128xbf16>, vector<128x128xbf16>, vector<8x128xf32> -> vector<8x128xf32>
      %c0_19 = arith.constant 0 : index
      %c0_20 = arith.constant 0 : index
      %25 = vector.load %arg7[%c0_19, %c0_20] : memref<1x128xf32, #tpu.memory_space<vmem>>, vector<1x128xf32>
      %26 = vector.broadcast %25 : vector<1x128xf32> to vector<8x128xf32>
      %27 = arith.addf %24, %26 : vector<8x128xf32>
      %28 = arith.truncf %27 : vector<8x128xf32> to vector<8x128xbf16>
      %c0_21 = arith.constant 0 : index
      %c0_22 = arith.constant 0 : index
      %29 = vector.load %arg8[%c0_21, %c0_22] : memref<8x128xbf16, #tpu.memory_space<vmem>>, vector<8x128xbf16>
      tpu.vector_store %arg8[%c0_21, %c0_22], %28 {strides = array<i32>} : memref<8x128xbf16, #tpu.memory_space<vmem>>, vector<8x128xbf16>,
    } else {
    }
    return
  }
  func.func @transform_0(%arg0: i32, %arg1: i32) -> i32 {
    %c0_i32 = arith.constant 0 : i32
    %c0_i32_0 = arith.constant 0 : i32
    return %c0_i32 : i32
  }
  func.func @transform_1(%arg0: i32, %arg1: i32) -> (i32, i32) {
    %c0_i32 = arith.constant 0 : i32
    return %arg0, %arg1 : i32, i32
  }
  func.func @transform_2(%arg0: i32, %arg1: i32) -> (i32, i32) {
    %c0_i32 = arith.constant 0 : i32
    %c0_i32_0 = arith.constant 0 : i32
    return %arg1, %c0_i32 : i32, i32
  }
  func.func @transform_3(%arg0: i32, %arg1: i32) -> (i32, i32) {
    %c0_i32 = arith.constant 0 : i32
    %c0_i32_0 = arith.constant 0 : i32
    %c0_i32_1 = arith.constant 0 : i32
    return %c0_i32, %c0_i32_0 : i32, i32
  }
  func.func @transform_4(%arg0: i32, %arg1: i32) -> (i32, i32) {
    %c0_i32 = arith.constant 0 : i32
    %c0_i32_0 = arith.constant 0 : i32
    %c0_i32_1 = arith.constant 0 : i32
    return %c0_i32, %c0_i32_0 : i32, i32
  }
  func.func @transform_5(%arg0: i32, %arg1: i32) -> (i32, i32) {
    %c0_i32 = arith.constant 0 : i32
    %c0_i32_0 = arith.constant 0 : i32
    %c0_i32_1 = arith.constant 0 : i32
    return %c0_i32, %c0_i32_0 : i32, i32
  }
  func.func @transform_6(%arg0: i32, %arg1: i32) -> (i32, i32) {
    %c0_i32 = arith.constant 0 : i32
    %c0_i32_0 = arith.constant 0 : i32
    return %arg0, %c0_i32 : i32, i32
  }
}

</mosaic_0001>

<bundles_post_ra>
// kernel: tpu_custom_call.1
= control target key start
LH: loop header
LB: loop body
LE: loop exit
PB: predicated region body
PF: predicated region fallthrough
CT: control target
= control target key end

     0   :  { %12 = vsyncpa [#allocation5], 0  ;;  %s1478_s0 = inlined_call_operand.<no memory space> [shape: f32[1], index: 0, kind: input, shape index: {}]   ;;  %s1479_s1 = inlined_call_operand.hbm [shape: bf16[2,1024], index: 1, kind: input, shape index: {}]   ;;  %s1480_s2 = inlined_call_operand.hbm [shape: bf16[1024,128], index: 2, kind: input, shape index: {}]   ;;  %s1481_s3 = inlined_call_operand.vmem [shape: f32[1,128], index: 3, kind: input, shape index: {}]   ;;  %s1482_s4 = inlined_call_operand.hbm [shape: bf16[128,128], index: 4, kind: input, shape index: {}]   ;;  %s1483_s5 = inlined_call_operand.vmem [shape: f32[1,128], index: 5, kind: input, shape index: {}]   ;;  %s1484_s6 = inlined_call_operand.hbm [shape: bf16[2,128], index: 6, kind: output, shape index: {}]  }
   0x1   :  { %13 = vsyncpa [#allocation8], 0 }
   0x2   :  { %14 = vsyncpa [#allocation6], 0 }
   0x3   :  { %21 = vsyncadd [#allocation5], 384  ;;  %s1382_s21 = smov [#allocation7]  }
   0x4   :  { %s34_s22 = sshll.u32 %s1382_s21, 4  ;;  %s35_s22 = int_to_ptr.vmem [resolvable:$true] %s34_s22 }
   0x5   :  { %s1304_s23 = scalar_lea.vmem %s35_s22, 8192  ;;  %p1309_p1 = scmp.lt.s32.totalorder %s35_s22, %s35_s22 }
   0x6   :  { %p1305_p0 = scmp.ne.s32.totalorder %s35_s22, %s1304_s23  ;;  %p1310_p2 = scmp.lt.s32.totalorder %s1304_s23, %s1304_s23 }
   0x8   :  { %p1311_p3 = por %p1310_p2, %p1309_p1 }
   0xa   :  { %p1312_p4 = pnand %p1311_p3, %p1305_p0 }
   0xc   :  { %1315 = shalt.err (!%p1312_p4)
}
   0xd   :  { %s1383_s24 = smov 64   ;;  %s1384_s25 = smov 4  }
   0xe   :  { %40 = dma.hbm_to_vmem [thread:$0]  %s1480_s2, 8192, %s35_s22, [#allocation8], %s1383_s24, %s1383_s24, %s1384_s25  }
   0xf   :  { %s1385_s28 = smov [#allocation4]  }
  0x10   :  { %s22_s29 = sshll.u32 %s1385_s28, 4  ;;  %s23_s29 = int_to_ptr.vmem [resolvable:$true] %s22_s29 }
  0x11   :  { %s1324_s30 = scalar_lea.vmem %s23_s29, 128  ;;  %s1328_s7 = scalar_lea.vmem %s23_s29, 512 }
  0x12   :  { %p1325_p5 = scmp.ne.s32.totalorder %s23_s29, %s1324_s30  ;;  %p1329_p6 = scmp.lt.s32.totalorder %s23_s29, %s23_s29 }
  0x13   :  { %p1330_p7 = scmp.lt.s32.totalorder %s1328_s7, %s1324_s30 }
  0x15   :  { %p1331_p8 = por %p1330_p7, %p1329_p6 }
  0x17   :  { %p1332_p9 = pnand %p1331_p8, %p1325_p5 }
  0x19   :  { %1335 = shalt.err (!%p1332_p9)
}
  0x1a   :  { %s1386_s8 = smov 128   ;;  %s1387_s9 = smov 8  }
  0x1b   :  { %28 = dma.hbm_to_vmem [thread:$0]  %s1479_s1, 128, %s23_s29, [#allocation5], %s1386_s8, %s1386_s8, %s1387_s9  }
  0x1c   :  { %s1388_s12 = smov [#allocation9]  }
  0x1d   :  { %s48_s13 = sshll.u32 %s1388_s12, 4  ;;  %s49_s13 = int_to_ptr.vmem [resolvable:$true] %s48_s13 }
  0x1e   :  { %s1344_s2 = scalar_lea.vmem %s49_s13, 1024  ;;  %p1349_p11 = scmp.lt.s32.totalorder %s49_s13, %s49_s13 }
  0x1f   :  { %p1345_p10 = scmp.ne.s32.totalorder %s49_s13, %s1344_s2  ;;  %p1350_p12 = scmp.lt.s32.totalorder %s1344_s2, %s1344_s2 }
  0x21   :  { %p1351_p13 = por %p1350_p12, %p1349_p11 }
  0x23   :  { %p1352_p0 = pnand %p1351_p13, %p1345_p10 }
  0x25   :  { %1355 = shalt.err (!%p1352_p0)
}
  0x26   :  { %54 = dma.hbm_to_vmem [thread:$0]  %s1482_s4, 1024, %s49_s13, [#allocation8], %s1383_s24, %s1383_s24, %s1384_s25  }
  0x27   :  { %1376 = dma.done.wait [#allocation5], 512  }
  0x28   :  { %1377 = vsyncadd [#allocation5], 4294966784 }
  0x29   :  { %1378 = dma.done.wait [#allocation8], 9216  }
  0x2a   :  { %1379 = vsyncadd [#allocation8], 4294958080  ;;  %v1218_v0 = vld [vmem:[#allocation7 + $0x78] sm:$0xff]   ;;  %v1222_v4 = vld [vmem:[#allocation7 + $0x70] sm:$0xff]   ;;  %v1389_v24 = vmov 1966171168   ;;  %v216_v26 = vlaneseq }
  0x2b   :  { %v1219_v1 = vld [vmem:[#allocation7 + $0xf8] sm:$0xff]   ;;  %1088 = vmatprep.subr.bf16.mxu0 %v1218_v0  ;;  %v1223_v5 = vld [vmem:[#allocation7 + $0xf0] sm:$0xff]   ;;  %v1226_v8 = vld [vmem:[#allocation7 + $0x68] sm:$0xff]   ;;  %v214_v25 = vunpack.c.l.s4 %v1389_v24  ;;  %vm1391_vm0 = vmmov 0  }
  0x2c   :  { %v1220_v2 = vld [vmem:[#allocation7 + $0x38] sm:$0xff]   ;;  %1110 = vmatprep.subr.bf16.mxu1 %v1219_v1  ;;  %v1224_v6 = vld [vmem:[#allocation7 + $0x30] sm:$0xff]   ;;  %v1227_v9 = vld [vmem:[#allocation7 + $0xe8] sm:$0xff]   ;;  %v217_v32 = vshrl.u32 %v216_v26, 7 }
  0x2d   :  { %v1221_v3 = vld [vmem:[#allocation7 + $0xb8] sm:$0xff]   ;;  %1089 = vmatpush3.bf16.msra.mxu0 %v1220_v2  ;;  %v1225_v7 = vld [vmem:[#allocation7 + $0xb0] sm:$0xff]   ;;  %v1228_v10 = vld [vmem:[#allocation7 + $0x28] sm:$0xff]   ;;  %v215_v31 = vunpack.c.0.s8 %v214_v25 }
  0x2e   :  { %1111 = vmatpush3.bf16.msra.mxu1 %v1221_v3  ;;  %1090 = vmatprep.subr.bf16.mxu0 %v1222_v4  ;;  %v1229_v11 = vld [vmem:[#allocation7 + $0xa8] sm:$0xff]   ;;  %v1230_v12 = vld [vmem:[#allocation7 + $0x60] sm:$0xff]   ;;  %v1234_v16 = vld [vmem:[#allocation7 + $0x58] sm:$0xff]  }
  0x2f   :  { %1112 = vmatprep.subr.bf16.mxu1 %v1223_v5  ;;  %v1231_v13 = vld [vmem:[#allocation7 + $0xe0] sm:$0xff]   ;;  %v1235_v17 = vld [vmem:[#allocation7 + $0xd8] sm:$0xff]   ;;  %v1238_v20 = vld [vmem:[#allocation7 + $0x50] sm:$0xff]   ;;  %v1445_v37 = vsub.s32 %v215_v31, %v217_v32 }
  0x30   :  { %v1232_v14 = vld [vmem:[#allocation7 + $0x20] sm:$0xff]   ;;  %v1236_v18 = vld [vmem:[#allocation7 + $0x18] sm:$0xff]   ;;  %v1239_v21 = vld [vmem:[#allocation7 + $0xd0] sm:$0xff]  }
  0x31   :  { %1091 = vmatpush3.bf16.msra.mxu0 %v1224_v6  ;;  %v1233_v15 = vld [vmem:[#allocation7 + $0xa0] sm:$0xff]   ;;  %v1237_v19 = vld [vmem:[#allocation7 + $0x98] sm:$0xff]   ;;  %v1240_v22 = vld [vmem:[#allocation7 + $0x10] sm:$0xff]  }
  0x32   :  { %1113 = vmatpush3.bf16.msra.mxu1 %v1225_v7  ;;  %1092 = vmatprep.subr.bf16.mxu0 %v1226_v8  ;;  %v1241_v23 = vld [vmem:[#allocation7 + $0x90] sm:$0xff]   ;;  %v1242_v27 = vld [vmem:[#allocation7 + $0x48] sm:$0xff]   ;;  %v1246_v33 = vld [vmem:[#allocation7 + $0x40] sm:$0xff]  }
  0x33   :  { %1114 = vmatprep.subr.bf16.mxu1 %v1227_v9  ;;  %v1243_v28 = vld [vmem:[#allocation7 + $0xc8] sm:$0xff]   ;;  %v1247_v34 = vld [vmem:[#allocation7 + $0xc0] sm:$0xff]   ;;  %v1253_v40 = vld [vmem:[#allocation4 + $0x10] ss:$8 sps:$4 sm:$0xff]  }
  0x34   :  { %v1244_v29 = vld [vmem:[#allocation7 + $0x8] sm:$0xff]   ;;  %v1248_v35 = vld [vmem:[#allocation7] sm:$0xff]   ;;  %v1255_v41 = vld [vmem:[#allocation4 + $0x14] ss:$8 sps:$4 sm:$0xff]   ;;  %v233_v45 = vrot.slane %v1253_v40, %v1445_v37 }
  0x35   :  { %1093 = vmatpush3.bf16.msra.mxu0 %v1228_v10  ;;  %v1245_v30 = vld [vmem:[#allocation7 + $0x88] sm:$0xff]   ;;  %v1249_v36 = vld [vmem:[#allocation7 + $0x80] sm:$0xff]   ;;  %v1256_v43 = vld [vmem:[#allocation7 + $0x178] sm:$0xff]   ;;  %v1453_v47 = vrot.slane %v1255_v41, %v1445_v37 }
  0x36   :  { %1115 = vmatpush3.bf16.msra.mxu1 %v1229_v11  ;;  %1094 = vmatprep.subr.bf16.mxu0 %v1230_v12  ;;  %v1250_v38 = vld [vmem:[#allocation4] ss:$8 sps:$4 sm:$0xff]   ;;  %v1252_v39 = vld [vmem:[#allocation4 + $0x4] ss:$8 sps:$4 sm:$0xff]   ;;  %v1257_v46 = vld [vmem:[#allocation7 + $0x1f8] sm:$0xff]  }
  0x37   :  { %1116 = vmatprep.subr.bf16.mxu1 %v1231_v13  ;;  %v219_v42 = vrot.slane %v1250_v38, %v1445_v37  ;;  %v1449_v44 = vrot.slane %v1252_v39, %v1445_v37  ;;  %v1258_v51 = vld [vmem:[#allocation7 + $0x138] sm:$0xff]   ;;  %v1260_v56 = vld [vmem:[#allocation7 + $0x170] sm:$0xff]   ;;  %v1264_v63 = vld [vmem:[#allocation7 + $0x168] sm:$0xff]  }
  0x38   :  { %v1259_v54 = vld [vmem:[#allocation7 + $0x1b8] sm:$0xff]   ;;  %v1261_v59 = vld [vmem:[#allocation7 + $0x1f0] sm:$0xff]   ;;  %v1265_v0 = vld [vmem:[#allocation7 + $0x1e8] sm:$0xff]  }
  0x39   :  { %1095 = vmatpush3.bf16.msra.mxu0 %v1232_v14  ;;  %v242_v48 = vcombine.high %v219_v42, %v233_v45  ;;  %v241_v49 = vcombine.low %v219_v42, %v233_v45  ;;  %v244_v50 = vcombine.high %v1449_v44, %v1453_v47  ;;  %v1262_v60 = vld [vmem:[#allocation7 + $0x130] sm:$0xff]   ;;  %v1266_v1 = vld [vmem:[#allocation7 + $0x128] sm:$0xff]   ;;  %v1268_v3 = vld [vmem:[#allocation7 + $0x160] sm:$0xff]  }
  0x3a   :  { %1117 = vmatpush3.bf16.msra.mxu1 %v1233_v15  ;;  %1096 = vmatprep.subr.bf16.mxu0 %v1234_v16  ;;  %v1263_v62 = vld [vmem:[#allocation7 + $0x1b0] sm:$0xff]   ;;  %v1267_v2 = vld [vmem:[#allocation7 + $0x1a8] sm:$0xff]   ;;  %v1269_v4 = vld [vmem:[#allocation7 + $0x1e0] sm:$0xff]  }
  0x3b   :  { %1118 = vmatprep.subr.bf16.mxu1 %v1235_v17  ;;  %v265_v52 = vrot.slane %v242_v48, %v1445_v37  ;;  %v251_v53 = vrot.slane %v241_v49, %v1445_v37  ;;  %v272_v55 = vrot.slane %v244_v50, %v1445_v37  ;;  %v1270_v5 = vld [vmem:[#allocation7 + $0x120] sm:$0xff]   ;;  %v1272_v7 = vld [vmem:[#allocation7 + $0x158] sm:$0xff]   ;;  %v1276_v11 = vld [vmem:[#allocation7 + $0x150] sm:$0xff]  }
  0x3c   :  { %v1271_v6 = vld [vmem:[#allocation7 + $0x1a0] sm:$0xff]   ;;  %v1273_v8 = vld [vmem:[#allocation7 + $0x1d8] sm:$0xff]   ;;  %v1277_v12 = vld [vmem:[#allocation7 + $0x1d0] sm:$0xff]  }
  0x3d   :  { %1097 = vmatpush3.bf16.msra.mxu0 %v1236_v18  ;;  %701 = vmatprep.mubr.bf16.mxu0 %v265_v52  ;;  %v275_v57 = vcombine.high %v265_v52, %v265_v52  ;;  %v273_v58 = vcombine.high %v251_v53, %v251_v53  ;;  %v276_v61 = vcombine.high %v272_v55, %v272_v55  ;;  %v1274_v9 = vld [vmem:[#allocation7 + $0x118] sm:$0xff]   ;;  %v1278_v13 = vld [vmem:[#allocation7 + $0x110] sm:$0xff]   ;;  %v1280_v15 = vld [vmem:[#allocation7 + $0x148] sm:$0xff]  }
  0x3e   :  { %1119 = vmatpush3.bf16.msra.mxu1 %v1237_v19  ;;  %1098 = vmatprep.subr.bf16.mxu0 %v1238_v20  ;;  %v1275_v10 = vld [vmem:[#allocation7 + $0x198] sm:$0xff]   ;;  %v1279_v14 = vld [vmem:[#allocation7 + $0x190] sm:$0xff]   ;;  %v1281_v16 = vld [vmem:[#allocation7 + $0x1c8] sm:$0xff]  }
  0x3f   :  { %1120 = vmatprep.subr.bf16.mxu1 %v1239_v21  ;;  %741 = vmatprep.mubr.bf16.mxu1 %v275_v57  ;;  %v1282_v17 = vld [vmem:[#allocation7 + $0x108] sm:$0xff]   ;;  %v1284_v19 = vld [vmem:[#allocation7 + $0x140] sm:$0xff]   ;;  %v243_v21 = vcombine.low %v1449_v44, %v1453_v47  ;;  %v1288_v26 = vld [vmem:[#allocation9 + $0x38] sm:$0xff]  }
  0x40   :  { %v1283_v18 = vld [vmem:[#allocation7 + $0x188] sm:$0xff]   ;;  %v1285_v20 = vld [vmem:[#allocation7 + $0x1c0] sm:$0xff]   ;;  %v1292_v31 = vld [vmem:[#allocation9 + $0x18] sm:$0xff]  }
  0x41   :  { %1099 = vmatpush3.bf16.msra.mxu0 %v1240_v22  ;;  %v1286_v22 = vld [vmem:[#allocation7 + $0x100] sm:$0xff]   ;;  %v258_v24 = vrot.slane %v243_v21, %v1445_v37  ;;  %v1293_v32 = vld [vmem:[#allocation9 + $0x10] sm:$0xff]  }
  0x42   :  { %1121 = vmatpush3.bf16.msra.mxu1 %v1241_v23  ;;  %1100 = vmatprep.subr.bf16.mxu0 %v1242_v27  ;;  %v1287_v23 = vld [vmem:[#allocation7 + $0x180] sm:$0xff]   ;;  %v1390_v27 = vmov 0.0  }
  0x43   :  { %1122 = vmatprep.subr.bf16.mxu1 %v1243_v28  ;;  %v274_v25 = vcombine.high %v258_v24, %v258_v24  ;;  %v1289_v28 = vld [vmem:[#allocation9 + $0x30] sm:$0xff]  }
  0x45   :  { %1101 = vmatpush3.bf16.msra.mxu0 %v1244_v29  ;;  %v1290_v29 = vld [vmem:[#allocation9 + $0x28] sm:$0xff]  }
  0x46   :  { %1123 = vmatpush3.bf16.msra.mxu1 %v1245_v30  ;;  %1102 = vmatprep.subr.bf16.mxu0 %v1246_v33  ;;  %v1291_v30 = vld [vmem:[#allocation9 + $0x20] sm:$0xff]   ;;  %v1294_v33 = vld [vmem:[#allocation9 + $0x8] sm:$0xff]  }
  0x47   :  { %1124 = vmatprep.subr.bf16.mxu1 %v1247_v34  ;;  %v1295_v34 = vld [vmem:[#allocation9] sm:$0xff]  }
  0x49   :  { %1103 = vmatpush3.bf16.msra.mxu0 %v1248_v35 }
  0x4a   :  { %1125 = vmatpush3.bf16.msra.mxu1 %v1249_v36  ;;  %1132 = vmatprep.subr.bf16.mxu0 %v1256_v43 }
  0x4b   :  { %1154 = vmatprep.subr.bf16.mxu1 %v1257_v46 }
  0x4c   :  { %702 = vmatmul.mubr.bf16.vlgmr.msra.gmra.mxu0 %v251_v53 }
  0x4d   :  { %1133 = vmatpush3.bf16.msra.mxu0 %v1258_v51  ;;  %742 = vmatmul.mubr.bf16.vlgmr.msra.gmra.mxu1 %v273_v58 }
  0x4e   :  { %1134 = vmatprep.subr.bf16.mxu0 %v1260_v56  ;;  %1155 = vmatpush3.bf16.msra.mxu1 %v1259_v54 }
  0x4f   :  { %781 = vmatprep.mubr.bf16.mxu0 %v272_v55  ;;  %1156 = vmatprep.subr.bf16.mxu1 %v1261_v59  ;;  %v1076_v55 = vld [vmem:[%s1481_s3] ss:$0 sm:$0xff]  ;;  %v845_v59 = vstv %s1478_s0 }
  0x50   :  { %821 = vmatprep.mubr.bf16.mxu1 %v276_v61 }
  0x51   :  { %1135 = vmatpush3.bf16.msra.mxu0 %v1262_v60 }
  0x52   :  { %1136 = vmatprep.subr.bf16.mxu0 %v1264_v63  ;;  %1157 = vmatpush3.bf16.msra.mxu1 %v1263_v62 }
  0x53   :  { %1158 = vmatprep.subr.bf16.mxu1 %v1265_v0 }
  0x55   :  { %1137 = vmatpush3.bf16.msra.mxu0 %v1266_v1  ;;  %v1077_v1 = vld [vmem:[%s1483_s5] ss:$0 sm:$0xff] }
  0x56   :  { %1138 = vmatprep.subr.bf16.mxu0 %v1268_v3  ;;  %1159 = vmatpush3.bf16.msra.mxu1 %v1267_v2 }
  0x57   :  { %1160 = vmatprep.subr.bf16.mxu1 %v1269_v4 }
  0x59   :  { %1139 = vmatpush3.bf16.msra.mxu0 %v1270_v5 }
  0x5a   :  { %1140 = vmatprep.subr.bf16.mxu0 %v1272_v7  ;;  %1161 = vmatpush3.bf16.msra.mxu1 %v1271_v6 }
  0x5b   :  { %1162 = vmatprep.subr.bf16.mxu1 %v1273_v8 }
  0x5d   :  { %1141 = vmatpush3.bf16.msra.mxu0 %v1274_v9 }
  0x5e   :  { %1142 = vmatprep.subr.bf16.mxu0 %v1276_v11  ;;  %1163 = vmatpush3.bf16.msra.mxu1 %v1275_v10 }
  0x5f   :  { %1164 = vmatprep.subr.bf16.mxu1 %v1277_v12 }
  0x61   :  { %1143 = vmatpush3.bf16.msra.mxu0 %v1278_v13 }
  0x62   :  { %1144 = vmatprep.subr.bf16.mxu0 %v1280_v15  ;;  %1165 = vmatpush3.bf16.msra.mxu1 %v1279_v14 }
  0x63   :  { %1166 = vmatprep.subr.bf16.mxu1 %v1281_v16 }
  0x65   :  { %1145 = vmatpush3.bf16.msra.mxu0 %v1282_v17 }
  0x66   :  { %1146 = vmatprep.subr.bf16.mxu0 %v1284_v19  ;;  %1167 = vmatpush3.bf16.msra.mxu1 %v1283_v18 }
  0x67   :  { %1168 = vmatprep.subr.bf16.mxu1 %v1285_v20 }
  0x69   :  { %1147 = vmatpush3.bf16.msra.mxu0 %v1286_v22 }
  0x6a   :  { %1169 = vmatpush3.bf16.msra.mxu1 %v1287_v23  ;;  %1185 = vmatprep.subr.bf16.mxu0 %v1390_v27 }
  0x6c   :  { %782 = vmatmul.mubr.bf16.vlgmr.msra.gmra.mxu0 %v258_v24 }
  0x6d   :  { %822 = vmatmul.mubr.bf16.vlgmr.msra.gmra.mxu1 %v274_v25  ;;  %1186 = vmatpush3.bf16.msra.mxu0 %v1288_v26 }
  0x6e   :  { %1187 = vmatprep.subr.bf16.mxu0 %v1390_v27  ;;  %1201 = vmatprep.mubr.msk.bf16.mxu0 %vm1391_vm0, %v1390_v27 }
  0x71   :  { %1188 = vmatpush3.bf16.msra.mxu0 %v1289_v28 }
  0x72   :  { %1189 = vmatprep.subr.bf16.mxu0 %v1390_v27 }
  0x75   :  { %1190 = vmatpush3.bf16.msra.mxu0 %v1290_v29 }
  0x76   :  { %1191 = vmatprep.subr.bf16.mxu0 %v1390_v27 }
  0x79   :  { %1192 = vmatpush3.bf16.msra.mxu0 %v1291_v30 }
  0x7a   :  { %1193 = vmatprep.subr.bf16.mxu0 %v1390_v27 }
  0x7d   :  { %1194 = vmatpush3.bf16.msra.mxu0 %v1292_v31 }
  0x7e   :  { %1195 = vmatprep.subr.bf16.mxu0 %v1390_v27 }
  0x81   :  { %1196 = vmatpush3.bf16.msra.mxu0 %v1293_v32 }
  0x82   :  { %1197 = vmatprep.subr.bf16.mxu0 %v1390_v27 }
  0x85   :  { %1198 = vmatpush3.bf16.msra.mxu0 %v1294_v33 }
  0x86   :  { %1199 = vmatprep.subr.bf16.mxu0 %v1390_v27 }
  0x89   :  { %1200 = vmatpush3.bf16.msra.mxu0 %v1295_v34 }
 0x10c   :  { %v1104_v35 = vpop.f32.mrf.mxu0 }
 0x10d   :  { %v1126_v36 = vpop.f32.mrf.mxu1 }
 0x10e   :  { %v1105_v38 = vpop.f32.mrf.mxu0 }
 0x10f   :  { %v1127_v39 = vpop.f32.mrf.mxu1  ;;  %v1106_v44 = vadd.f32 %v1105_v38, %v1104_v35 }
 0x110   :  { %v1107_v40 = vpop.f32.mrf.mxu0  ;;  %v1128_v45 = vadd.f32 %v1127_v39, %v1126_v36 }
 0x111   :  { %v1129_v41 = vpop.f32.mrf.mxu1 }
 0x112   :  { %v1108_v42 = vpop.f32.mrf.mxu0  ;;  %v744_v49 = vadd.f32 %v1128_v45, %v1106_v44 }
 0x113   :  { %v1130_v43 = vpop.f32.mrf.mxu1 }
 0x12c   :  { %v1148_v46 = vpop.f32.mrf.mxu0 }
 0x12d   :  { %v1170_v47 = vpop.f32.mrf.mxu1 }
 0x12e   :  { %v1149_v48 = vpop.f32.mrf.mxu0 }
 0x12f   :  { %v1150_v50 = vadd.f32 %v1149_v48, %v1148_v46  ;;  %v1171_v51 = vpop.f32.mrf.mxu1 }
 0x130   :  { %v1151_v52 = vpop.f32.mrf.mxu0  ;;  %v1172_v54 = vadd.f32 %v1171_v51, %v1170_v47 }
 0x131   :  { %v784_v53 = vadd.f32 %v1150_v50, %v744_v49  ;;  %v1173_v56 = vpop.f32.mrf.mxu1 }
 0x132   :  { %v1152_v57 = vpop.f32.mrf.mxu0 }
 0x133   :  { %v824_v58 = vadd.f32 %v1172_v54, %v784_v53  ;;  %v1174_v60 = vpop.f32.mrf.mxu1 }
 0x135   :  { %v842_v61 = vadd.f32 %v1076_v55, %v824_v58 }
 0x137   :  { %vm844_vm1 = vcmp.ge.f32.partialorder %v842_v61, 0.0  ;;  %v846_v62 = vmul.f32 %v845_v59, %v842_v61 }
 0x139   :  { %v847_v63 = vsel %vm844_vm1, %v842_v61, %v846_v62 }
 0x13a   :  { %v848_v0 = vpack.c.bf16 %v847_v63, %v847_v63 }
 0x13c   :  { %1202 = vmatmul.mubr.bf16.vlgmr.msra.gmra.mxu0 %v848_v0 }
 0x1fc   :  { %v954_v2 = vpop.f32.mrf.mxu0 }
 0x1fd   :  { %v955_v3 = vadd.f32 %v1077_v1, %v954_v2 }
 0x1fe   :  { %v1203_v4 = vpop.f32.mrf.mxu0 }
 0x1ff   :  { %v960_v5 = vpack.c.bf16 %v955_v3, %v955_v3 }
 0x200   :  { %v957_v6 = vpop.f32.mrf.mxu0 }
 0x201   :  { %v968_v7 = vrot.slane %v960_v5, %v1445_v37 }
 0x202   :  { %v1204_v8 = vpop.f32.mrf.mxu0 }
 0x203   :  { %v969_v9 = vcombine.high %v968_v7, %v968_v7  ;;  %v976_v10 = vrot.slane %v968_v7, %v1445_v37  ;;  %1086 = vst.sshfl [vmem:[#allocation10] sm:$0x1 pattern:$0x73625140] %v968_v7 }
 0x205   :  { %v983_v11 = vrot.slane %v969_v9, %v1445_v37  ;;  %v984_v12 = vcombine.high %v976_v10, %v976_v10  ;;  %1087 = vst.sshfl [vmem:[#allocation10 + $0x1] sm:$0x1 pattern:$0x73625140] %v969_v9 }
 0x207   :  { %v985_v13 = vcombine.high %v983_v11, %v983_v11  ;;  %992 = vst [vmem:[#allocation10 + $0x2] sm:$0x1] %v984_v12 }
 0x209   :  { %993 = vst [vmem:[#allocation10 + $0x3] sm:$0x1] %v985_v13 }
 0x20a   :  { %998 = vsyncadd [#allocation6], 48  ;;  %s1392_s0 = smov [#allocation10]  }
 0x20b   :  { %s999_s3 = sshll.u32 %s1392_s0, 4  ;;  %s1000_s3 = int_to_ptr.vmem [resolvable:$true] %s999_s3 }
 0x20c   :  { %s1356_s5 = scalar_lea.vmem %s1000_s3, 16  ;;  %s1360_s20 = scalar_lea.vmem %s1000_s3, 64 }
 0x20d   :  { %p1357_p1 = scmp.ne.s32.totalorder %s1000_s3, %s1356_s5  ;;  %p1361_p2 = scmp.lt.s32.totalorder %s1000_s3, %s1000_s3 }
 0x20e   :  { %p1362_p3 = scmp.lt.s32.totalorder %s1360_s20, %s1356_s5 }
 0x210   :  { %p1363_p4 = por %p1362_p3, %p1361_p2 }
 0x212   :  { %p1364_p5 = pnand %p1363_p4, %p1357_p1 }
 0x214   :  { %1367 = shalt.err (!%p1364_p5)
}
 0x215   :  { %s1393_s21 = smov 16   ;;  %s1394_s22 = smov 1  }
 0x216   :  { %1005 = dma.vmem_to_hbm [thread:$0]  %s1000_s3, 16, %s1484_s6, [#allocation6], %s1393_s21, %s1393_s21, %s1394_s22  }
 0x217   :  { %1380 = dma.done.wait [#allocation6], 64  }
 0x218   :  { %1381 = vsyncadd [#allocation6], 4294967232 }
 0x219   :  { %1009 = vsyncpa [#allocation5], 1 }
 0x21a   :  { %1010 = vsyncpa [#allocation8], 1 }
 0x21b   :  { %1011 = vsyncpa [#allocation6], 1 }

</bundles_post_ra>
